<compile_context>
chip_gen: v5e
topology: v5e:2x2
jax: 0.10.0
libtpu: 0.0.40
codegen_flags: <defaults>
</compile_context>

<pallas_src>
import math

import jax
import jax.numpy as jnp
from jax import lax
from jax.experimental import pallas as pl
from jax.experimental.pallas import tpu as pltpu

BN_EPS = 1e-5
LANE = 128
MAX_TM = 2048  # max M-tile width (lanes); small enough for v7x's 32 MiB scoped VMEM


def conv_stats_kernel(w_ref, patch_ref, h_ref, psum_ref, psumsq_ref):
    """Per M-tile: h = W @ patches (MXU, f32 acc) + per-tile partial BN stats."""
    # w_ref: (Cout, K) bf16, patch_ref: (K, tm) bf16
    h = jnp.dot(w_ref[...], patch_ref[...], preferred_element_type=jnp.float32)
    h_ref[...] = h                                            # (Cout, tm), lane-dense store
    # Partial sums over the lane (M) axis; finalized (8 scalars/channel) in the wrapper.
    psum_ref[...] = jnp.sum(h, axis=-1, keepdims=True)[None]          # (1, Cout, 1)
    psumsq_ref[...] = jnp.sum(h * h, axis=-1, keepdims=True)[None]    # (1, Cout, 1)


def bn_relu_kernel(h_ref, scale_ref, shift_ref, o_ref):
    """Per M-tile: folded BN affine + ReLU in a single VPU pass pair."""
    o_ref[...] = jnp.maximum(h_ref[...] * scale_ref[...] + shift_ref[...], 0.0)


def cbr_forward(x_nchw, w_oihw, bias, gamma, beta):
    """CBR forward: x_nchw [N, Cin, H, W] -> [N, Cout, H//2, W//2] (training-mode BN)."""
    del bias  # conv bias is mathematically canceled by training-mode BatchNorm (mean shift)

    n, cin, h, w = x_nchw.shape
    cout, _, kh, kw = w_oihw.shape
    assert (kh, kw) == (4, 4)
    ho, wo = (h + 2 - 4) // 2 + 1, (w + 2 - 4) // 2 + 1
    m = n * ho * wo
    k = cin * 16

    # ---- im2col into (K, M): K = (ci, kh, kw), M = (n, oh, ow); M is the lane axis ----
    # TODO(synk): fuse im2col into the kernel (DMA padded NHWC slab + 16 shifted matmul
    # accumulations) to remove the 16x input-side HBM expansion at large sizes.
    xp = jnp.pad(x_nchw, ((0, 0), (0, 0), (1, 1), (1, 1)))
    cols = [xp[:, :, dh:dh + 2 * ho:2, dw:dw + 2 * wo:2]      # each [N, Cin, Ho, Wo]
            for dh in range(4) for dw in range(4)]
    patches = jnp.stack(cols, axis=0)                         # [16, N, Cin, Ho, Wo]
    patches = jnp.transpose(patches, (2, 0, 1, 3, 4)).reshape(k, m)   # (K, M)

    # pad M to a lane multiple; zero columns add 0 to sum and sumsq (no bias), so
    # dividing by the true M keeps BN statistics exact.
    mp = ((m + LANE - 1) // LANE) * LANE
    if mp != m:
        patches = jnp.pad(patches, ((0, 0), (0, mp - m)))
    patches = patches.astype(jnp.bfloat16)

    w2d = w_oihw.reshape(cout, k).astype(jnp.bfloat16)        # (Cout, K)

    tm = math.gcd(mp, MAX_TM)                                 # multiple of 128, divides mp
    t = mp // tm

    cparams = pltpu.CompilerParams(
        dimension_semantics=("parallel",),
        vmem_limit_bytes=32 * 1024 * 1024,
    )

    cost1 = pl.CostEstimate(
        flops=2 * cout * k * mp + 3 * cout * mp,
        transcendentals=0,
        bytes_accessed=k * mp * 2 + cout * k * 2 + cout * mp * 4 + 2 * t * cout * 4,
    )

    # ---- pass 1: conv-as-matmul + per-tile partial BN stats ----
    h2d, psum, psumsq = pl.pallas_call(
        conv_stats_kernel,
        out_shape=(
            jax.ShapeDtypeStruct((cout, mp), jnp.float32),
            jax.ShapeDtypeStruct((t, cout, 1), jnp.float32),
            jax.ShapeDtypeStruct((t, cout, 1), jnp.float32),
        ),
        grid=(t,),
        in_specs=[
            pl.BlockSpec((cout, k), lambda i: (0, 0)),
            pl.BlockSpec((k, tm), lambda i: (0, i)),
        ],
        out_specs=(
            pl.BlockSpec((cout, tm), lambda i: (0, i)),
            pl.BlockSpec((1, cout, 1), lambda i: (i, 0, 0)),
            pl.BlockSpec((1, cout, 1), lambda i: (i, 0, 0)),
        ),
        compiler_params=cparams,
        cost_estimate=cost1,
    )(w2d, patches)

    # ---- finalize global BN stats (per-channel scalars; trivial XLA work) ----
    sum_h = jnp.sum(psum, axis=0)                              # (Cout, 1)
    sumsq_h = jnp.sum(psumsq, axis=0)                          # (Cout, 1)
    mean = sum_h / m
    var = sumsq_h / m - mean * mean                            # biased variance (PyTorch BN fwd)
    scale = gamma.reshape(cout, 1) * lax.rsqrt(var + BN_EPS)
    shift = beta.reshape(cout, 1) - mean * scale

    cost2 = pl.CostEstimate(
        flops=3 * cout * mp,
        transcendentals=0,
        bytes_accessed=2 * cout * mp * 4 + 2 * cout * 4,
    )

    # ---- pass 2: normalize (folded scale/shift) + ReLU ----
    out2d = pl.pallas_call(
        bn_relu_kernel,
        out_shape=jax.ShapeDtypeStruct((cout, mp), jnp.float32),
        grid=(t,),
        in_specs=[
            pl.BlockSpec((cout, tm), lambda i: (0, i)),
            pl.BlockSpec((cout, 1), lambda i: (0, 0)),
            pl.BlockSpec((cout, 1), lambda i: (0, 0)),
        ],
        out_specs=pl.BlockSpec((cout, tm), lambda i: (0, i)),
        compiler_params=cparams,
        cost_estimate=cost2,
    )(h2d, scale, shift)

    # back to NCHW
    out = out2d[:, :m].reshape(cout, n, ho, wo)
    return jnp.transpose(out, (1, 0, 2, 3))


def cbr_reference(x_nchw, w_oihw, bias, gamma, beta):
    """Pure-JAX f32 reference (matches PyTorch CBR forward in training mode)."""
    h = lax.conv_general_dilated(
        x_nchw.astype(jnp.float32), w_oihw.astype(jnp.float32),
        window_strides=(2, 2), padding=((1, 1), (1, 1)),
        dimension_numbers=("NCHW", "OIHW", "NCHW"))
    h = h + bias.reshape(1, -1, 1, 1)
    mean = jnp.mean(h, axis=(0, 2, 3), keepdims=True)
    var = jnp.mean((h - mean) ** 2, axis=(0, 2, 3), keepdims=True)
    h = (h - mean) * lax.rsqrt(var + BN_EPS)
    h = h * gamma.reshape(1, -1, 1, 1) + beta.reshape(1, -1, 1, 1)
    return jnp.maximum(h, 0.0)


if __name__ == "__main__":
    # CBR(ch0=4, ch1=8, bn=True, sample='down', activation=ReLU, dropout=False)
    N, CIN, H, W = 2, 4, 16, 16
    COUT = 8

    key = jax.random.PRNGKey(0)
    kx, kw, kb, kg, kbe = jax.random.split(key, 5)
    x = jax.random.normal(kx, (N, CIN, H, W), dtype=jnp.float32)
    w = jax.random.normal(kw, (COUT, CIN, 4, 4), dtype=jnp.float32) * 0.1   # Conv2d.weight
    b = jax.random.normal(kb, (COUT,), dtype=jnp.float32) * 0.1             # Conv2d.bias
    gamma = 1.0 + 0.1 * jax.random.normal(kg, (COUT,), dtype=jnp.float32)   # BN weight
    beta = 0.1 * jax.random.normal(kbe, (COUT,), dtype=jnp.float32)         # BN bias

    out = jax.block_until_ready(cbr_forward(x, w, b, gamma, beta))
    ref = jax.block_until_ready(cbr_reference(x, w, b, gamma, beta))

    assert out.shape == (N, COUT, H // 2, W // 2)
    # bf16 matmul inputs (f32 accumulation + f32 BN stats) vs full-f32 reference:
    # tolerance loosened from 1e-4 to 5e-2 accordingly.
    assert jnp.max(jnp.abs(out - ref)) < 5e-2
    print("KERNEL_OK")
</pallas_src>

<mosaic_0001>
module attributes {stable_mosaic.version = 11 : i64} {
  func.func @conv_stats_kernel(%arg0: i32, %arg1: memref<8x64xbf16, #tpu.memory_space<vmem>>, %arg2: memref<64x128xbf16, #tpu.memory_space<vmem>>, %arg3: memref<8x128xf32, #tpu.memory_space<vmem>>, %arg4: memref<1x8x1xf32, #tpu.memory_space<vmem>>, %arg5: memref<1x8x1xf32, #tpu.memory_space<vmem>>) attributes {dimension_semantics = [#tpu.dimension_semantics<parallel>], iteration_bounds = array<i64: 1>, scalar_prefetch = 0 : i64, scratch_operands = 0 : i64, tpu.core_type = #tpu.core_type<tc>, window_params = [{pipeline_mode = #tpu.pipeline_mode<synchronous>, transform_indices = @transform_0, window_bounds = array<i64: 8, 64>}, {transform_indices = @transform_1, window_bounds = array<i64: 64, 128>}, {transform_indices = @transform_2, window_bounds = array<i64: 8, 128>}, {transform_indices = @transform_3, window_bounds = array<i64: 1, 8, 1>}, {transform_indices = @transform_4, window_bounds = array<i64: 1, 8, 1>}]} {
    %c0 = arith.constant 0 : index
    %c0_0 = arith.constant 0 : index
    %0 = vector.load %arg1[%c0, %c0_0] : memref<8x64xbf16, #tpu.memory_space<vmem>>, vector<8x64xbf16>
    %c0_1 = arith.constant 0 : index
    %c0_2 = arith.constant 0 : index
    %1 = vector.load %arg2[%c0_1, %c0_2] : memref<64x128xbf16, #tpu.memory_space<vmem>>, vector<64x128xbf16>
    %cst = arith.constant dense<0.000000e+00> : vector<8x128xf32>
    %2 = tpu.matmul %0, %1, %cst {dimension_numbers = #tpu.dot_dimension_numbers<[1], [0], [0], [1], [0, 0, 1, 1], [], []>} : vector<8x64xbf16>, vector<64x128xbf16>, vector<8x128xf32> -> vector<8x128xf32>
    %c0_3 = arith.constant 0 : index
    %c0_4 = arith.constant 0 : index
    %3 = vector.load %arg3[%c0_3, %c0_4] : memref<8x128xf32, #tpu.memory_space<vmem>>, vector<8x128xf32>
    tpu.vector_store %arg3[%c0_3, %c0_4], %2 {strides = array<i32>} : memref<8x128xf32, #tpu.memory_space<vmem>>, vector<8x128xf32>,
    %cst_5 = arith.constant dense<0.000000e+00> : vector<8xf32>
    %4 = vector.multi_reduction <add>, %2, %cst_5 [1] : vector<8x128xf32> to vector<8xf32>
    %5 = vector.shape_cast %4 : vector<8xf32> to vector<8x1xf32>
    %6 = vector.shape_cast %5 : vector<8x1xf32> to vector<1x8x1xf32>
    %c0_6 = arith.constant 0 : index
    %c0_7 = arith.constant 0 : index
    %c0_8 = arith.constant 0 : index
    %7 = vector.load %arg4[%c0_6, %c0_7, %c0_8] : memref<1x8x1xf32, #tpu.memory_space<vmem>>, vector<1x8x1xf32>
    tpu.vector_store %arg4[%c0_6, %c0_7, %c0_8], %6 {strides = array<i32>} : memref<1x8x1xf32, #tpu.memory_space<vmem>>, vector<1x8x1xf32>,
    %8 = arith.mulf %2, %2 : vector<8x128xf32>
    %cst_9 = arith.constant dense<0.000000e+00> : vector<8xf32>
    %9 = vector.multi_reduction <add>, %8, %cst_9 [1] : vector<8x128xf32> to vector<8xf32>
    %10 = vector.shape_cast %9 : vector<8xf32> to vector<8x1xf32>
    %11 = vector.shape_cast %10 : vector<8x1xf32> to vector<1x8x1xf32>
    %c0_10 = arith.constant 0 : index
    %c0_11 = arith.constant 0 : index
    %c0_12 = arith.constant 0 : index
    %12 = vector.load %arg5[%c0_10, %c0_11, %c0_12] : memref<1x8x1xf32, #tpu.memory_space<vmem>>, vector<1x8x1xf32>
    tpu.vector_store %arg5[%c0_10, %c0_11, %c0_12], %11 {strides = array<i32>} : memref<1x8x1xf32, #tpu.memory_space<vmem>>, vector<1x8x1xf32>,
    return
  }
  func.func @transform_0(%arg0: i32) -> (i32, i32) {
    %c0_i32 = arith.constant 0 : i32
    %c0_i32_0 = arith.constant 0 : i32
    %c0_i32_1 = arith.constant 0 : i32
    return %c0_i32, %c0_i32_0 : i32, i32
  }
  func.func @transform_1(%arg0: i32) -> (i32, i32) {
    %c0_i32 = arith.constant 0 : i32
    %c0_i32_0 = arith.constant 0 : i32
    return %c0_i32, %arg0 : i32, i32
  }
  func.func @transform_2(%arg0: i32) -> (i32, i32) {
    %c0_i32 = arith.constant 0 : i32
    %c0_i32_0 = arith.constant 0 : i32
    return %c0_i32, %arg0 : i32, i32
  }
  func.func @transform_3(%arg0: i32) -> (i32, i32, i32) {
    %c0_i32 = arith.constant 0 : i32
    %c0_i32_0 = arith.constant 0 : i32
    %c0_i32_1 = arith.constant 0 : i32
    return %arg0, %c0_i32, %c0_i32_0 : i32, i32, i32
  }
  func.func @transform_4(%arg0: i32) -> (i32, i32, i32) {
    %c0_i32 = arith.constant 0 : i32
    %c0_i32_0 = arith.constant 0 : i32
    %c0_i32_1 = arith.constant 0 : i32
    return %arg0, %c0_i32, %c0_i32_0 : i32, i32, i32
  }
}

</mosaic_0001>

<bundles_post_ra>
// kernel: tpu_custom_call.1
= control target key start
LH: loop header
LB: loop body
LE: loop exit
PB: predicated region body
PF: predicated region fallthrough
CT: control target
= control target key end

     0   :  { %10 = vsyncpa [#allocation3], 0  ;;  %s280_s0 = inlined_call_operand.hbm [shape: bf16[8,64], index: 0, kind: input, shape index: {}]   ;;  %s281_s1 = inlined_call_operand.hbm [shape: bf16[64,128], index: 1, kind: input, shape index: {}]   ;;  %s282_s2 = inlined_call_operand.hbm [shape: f32[8,128], index: 2, kind: output, shape index: {0}]   ;;  %s283_s3 = inlined_call_operand.vmem [shape: f32[1,8,1], index: 3, kind: output, shape index: {1}]   ;;  %s284_s4 = inlined_call_operand.vmem [shape: f32[1,8,1], index: 4, kind: output, shape index: {2}]  }
   0x1   :  { %11 = vsyncpa [#allocation6], 0 }
   0x2   :  { %12 = vsyncpa [#allocation4], 0  ;;  %s18_s17 = sshll.u32 %s280_s0, 4  ;;  %s235_s18 = smov [#allocation2]   ;;  %s19_s17 = int_to_ptr.hbm [resolvable:$true] %s18_s17 }
   0x3   :  { %s20_s19 = sshll.u32 %s235_s18, 4  ;;  %s28_s22 = sshll.u32 %s281_s1, 4  ;;  %s21_s19 = int_to_ptr.vmem [resolvable:$true] %s20_s19  ;;  %s29_s22 = int_to_ptr.hbm [resolvable:$true] %s28_s22 }
   0x4   :  { %23 = dma.hbm_to_vmem [thread:$0]  %s19_s17, 64, %s21_s19, [#allocation3]  }
   0x5   :  { %s236_s23 = smov [#allocation5]   ;;  %s237_s25 = smov 64  }
   0x6   :  { %s30_s24 = sshll.u32 %s236_s23, 4  ;;  %s238_s26 = smov 4   ;;  %s31_s24 = int_to_ptr.vmem [resolvable:$true] %s30_s24 }
   0x7   :  { %36 = dma.hbm_to_vmem [thread:$0]  %s29_s22, 512, %s31_s24, [#allocation6], %s237_s25, %s237_s25, %s238_s26  }
   0x8   :  { %229 = dma.done.wait [#allocation3], 64  }
   0x9   :  { %230 = vsyncadd [#allocation3], 4294967232 }
   0xa   :  { %231 = dma.done.wait [#allocation6], 512  }
   0xb   :  { %232 = vsyncadd [#allocation6], 4294966784  ;;  %v151_v0 = vld [vmem:[#allocation5 + $0x18] sm:$0xff]  ;;  %v150_v1 = vld [vmem:[#allocation5 + $0x10] sm:$0xff]  ;;  %vm79_vm0 = vcmask 523264   ;;  %s239_s0 = smov [#allocation7]  }
   0xc   :  { %87 = vmatpush.bf16.msra.mxu0 %v151_v0  ;;  %v149_v2 = vld [vmem:[#allocation5 + $0x8] sm:$0xff]  ;;  %v148_v3 = vld [vmem:[#allocation5] sm:$0xff]  ;;  %v46_v4 = vld [vmem:[#allocation2] sm:$0xf]  ;;  %s110_s1 = sshll.u32 %s239_s0, 4  ;;  %s112_s29 = sshll.u32 %s282_s2, 4  ;;  %s111_s1 = int_to_ptr.vmem [resolvable:$true] %s110_s1  ;;  %s113_s29 = int_to_ptr.hbm [resolvable:$true] %s112_s29 }
   0xd   :  { %vm99_vm1 = vcmask 7168  }
  0x10   :  { %88 = vmatpush.bf16.msra.mxu0 %v150_v1 }
  0x14   :  { %89 = vmatpush.bf16.msra.mxu0 %v149_v2 }
  0x18   :  { %90 = vmatpush.bf16.msra.mxu0 %v148_v3 }
  0x1b   :  { %147 = vmatmul.msk.bf16.vlgmr.msra.gmra.mxu0 %vm79_vm0, %v46_v4 }
  0x98   :  { %v92_v5 = vpop.f32.mrf.mxu0 }
  0x99   :  { %96 = vst [vmem:[#allocation7] sm:$0xff] %v92_v5  ;;  %97 = vadd.xlane.f32.xlu0 %v92_v5  ;;  %v101_v6 = vmul.f32 %v92_v5, %v92_v5 }
  0x9a   :  { %115 = dma.vmem_to_hbm [thread:$0]  %s111_s1, 128, %s113_s29, [#allocation4]  }
  0xa0   :  { %v94_v7 = vpop.f32.mrf.mxu0 }
  0xa1   :  { %102 = vadd.xlane.f32.xlu0 %v101_v6 }
 0x10c   :  { %v98_v8 = vpop.xlane.xlu0 %97 }
 0x10d   :  { %100 = vst.msk [vmem:[%s283_s3] sm:$0xff] %vm99_vm1, %v98_v8 }
 0x114   :  { %v103_v9 = vpop.xlane.xlu0 %102 }
 0x115   :  { %104 = vst.msk [vmem:[%s284_s4] sm:$0xff] %vm99_vm1, %v103_v9 }
 0x116   :  { %233 = dma.done.wait [#allocation4], 128  }
 0x117   :  { %234 = vsyncadd [#allocation4], 4294967168 }
 0x118   :  { %128 = vsyncpa [#allocation3], 1 }
 0x119   :  { %129 = vsyncpa [#allocation6], 1 }
 0x11a   :  { %130 = vsyncpa [#allocation4], 1 }

</bundles_post_ra>
